<compile_context>
chip_gen: v6e
topology: v6e:2x2x1
jax: 0.10.0
libtpu: 0.0.40
codegen_flags: <defaults>
</compile_context>

<pallas_src>
import jax
import jax.numpy as jnp
from jax.experimental import pallas as pl
from jax.experimental.pallas import tpu as pltpu


def acf_kernel(feat_ref, user_ref, profile_ref, mask_ref, posneg_ref,
               wmat_ref, wvec_ref, out_ref):
    N, C = feat_ref.shape              # N = B*P*L
    M, D = profile_ref.shape           # M = B*P
    B = posneg_ref.shape[0]
    P = M // B
    L = N // M
    D2 = 2 * D

    # ---- static slice loads from the packed parameter blocks (no extra DMAs) ----
    Wf = wmat_ref[pl.ds(0, C), :]                         # [C, 2D] = [Wr | Wr@Wxf]
    Wu2 = wmat_ref[pl.ds(C, D), :]                        # [D, 2D] = [Wuf | Wu]
    Wpx = wmat_ref[pl.ds(C + D, D2), pl.ds(0, D)]         # [2D, D] = [[Wp],[Wx]]
    b_f = wvec_ref[pl.ds(0, 1), :]                        # [1, 2D] = [br | br@Wxf+bxf]
    b_u = wvec_ref[pl.ds(1, 1), :]                        # [1, 2D] = [buf | bu]
    b_px = wvec_ref[pl.ds(2, 1), pl.ds(0, D)]             # [1, D]  = bp + bx
    wwf = wvec_ref[pl.ds(2, 1), pl.ds(D, D)]              # [1, D]  = Wwf^T
    ww = wvec_ref[pl.ds(3, 1), pl.ds(0, D)]               # [1, D]  = Ww^T

    # ---------------- ACFFeatureNet ----------------
    # One fused matmul yields both the dim-reduced features x and the
    # pre-user attention projection x_tilde (= x@Wxf + bxf, via folded weights).
    xx = jnp.dot(feat_ref[...], Wf, preferred_element_type=jnp.float32) + b_f   # [N, 2D]
    xx = xx.reshape(M, L, D2)                                                   # tile-aligned split
    x_red = xx[:, :, 0:D]                                                       # [M, L, D]
    x_tilde = xx[:, :, D:D2]                                                    # [M, L, D]

    # Fused user projections: [u_f | u] in one matmul, then broadcast per item.
    uu = jnp.dot(user_ref[...], Wu2, preferred_element_type=jnp.float32) + b_u  # [B, 2D]
    uu_m = jnp.broadcast_to(uu[:, None, :], (B, P, D2)).reshape(M, D2)          # [M, 2D]

    # Component attention head: VPU multiply + lane reduction (no N=1 MXU matmul).
    h = jnp.maximum(x_tilde + uu_m[:, None, 0:D], 0.0)                          # [M, L, D]
    blog = jnp.sum(h * wwf, axis=-1, keepdims=True)                             # [M, L, 1]
    blog = blog - jnp.max(blog, axis=1, keepdims=True)
    bexp = jnp.exp(blog)
    beta = bexp * pl.reciprocal(jnp.sum(bexp, axis=1, keepdims=True), approx=False)
    pooled = jnp.sum(beta * x_red, axis=1)                                      # [M, D]
    pooled = pooled * mask_ref[...]                                             # mask padded items

    # ---------------- ACFUserNet ----------------
    # Fused w_p / w_x: concat(profile, pooled) @ [[Wp],[Wx]]  (one K=2D matmul).
    cat = jnp.concatenate([profile_ref[...], pooled], axis=-1)                  # [M, 2D]
    pqcm = jnp.dot(cat, Wpx, preferred_element_type=jnp.float32) + b_px         # [M, D]
    a = jnp.maximum(uu_m[:, D:D2] + pqcm, 0.0)                                  # [M, D]
    lgt = jnp.sum(a * ww, axis=-1, keepdims=True)                               # [M, 1]

    # Masked softmax over the P profile items; all-masked rows -> 0 (torch nan->0).
    logits = lgt.reshape(B, P)
    valid = mask_ref[...].reshape(B, P) > 0.0
    mlog = jnp.where(valid, logits, jnp.float32(-1e30))
    e2 = jnp.where(valid, jnp.exp(mlog - jnp.max(mlog, axis=-1, keepdims=True)), 0.0)
    denom = jnp.sum(e2, axis=-1, keepdims=True)
    alpha = e2 * pl.reciprocal(jnp.where(denom > 0.0, denom, 1.0), approx=False)  # [B, P]

    user_profile = (alpha.reshape(M, 1) * profile_ref[...]).reshape(B, P, D).sum(axis=1)
    user_out = uu[:, D:D2] + user_profile                                       # [B, D]

    # ---------------- scoring (pos & neg fused) ----------------
    scores = jnp.sum(user_out[:, None, :] * posneg_ref[...], axis=-1) * jnp.float32(1.0 / D)

    # Single packed output block: [ user_out | pos | neg ].
    out_ref[...] = jnp.concatenate([user_out, scores], axis=-1)                 # [B, D+2]


def pack_params(p, C, D):
    """Fold/pack all weights into two arrays (done once, outside the hot path)."""
    Wrx = p["Wr"] @ p["Wxf"]                               # fold dim_reductor into w_x
    brx = p["br"] @ p["Wxf"] + p["bxf"]
    W_feat = jnp.concatenate([p["Wr"], Wrx], axis=1)       # [C, 2D]
    W_user = jnp.concatenate([p["Wuf"], p["Wu"]], axis=1)  # [D, 2D]
    W_px = jnp.concatenate([p["Wp"], p["Wx"]], axis=0)     # [2D, D]
    W_px = jnp.pad(W_px, ((0, 0), (0, D)))                 # [2D, 2D] (zero-padded cols)
    wmat = jnp.concatenate([W_feat, W_user, W_px], axis=0).astype(jnp.float32)  # [C+3D, 2D]

    b_feat = jnp.concatenate([p["br"], brx], axis=1)                      # [1, 2D]
    b_user = jnp.concatenate([p["buf"], p["bu"]], axis=1)                 # [1, 2D]
    row2 = jnp.concatenate([p["bp"] + p["bx"], p["Wwf"].T], axis=1)       # [1, 2D]
    row3 = jnp.concatenate([p["Ww"].T, jnp.zeros((1, D), jnp.float32)], axis=1)
    wvec = jnp.concatenate(
        [b_feat, b_user, row2, row3, jnp.zeros((4, 2 * D), jnp.float32)], axis=0
    ).astype(jnp.float32)                                                 # [8, 2D]
    # NOTE: bwf / bw (scalar biases of the two attention heads) are dropped on
    # purpose: both feed directly into a softmax, which is shift-invariant.
    return wmat, wvec


@jax.jit
def acf_forward(user_ids, profile_ids, pos, neg, user_table, item_table,
                feature_table, wmat, wvec):
    B, P = profile_ids.shape
    D = item_table.shape[-1]
    L = feature_table.shape[1] * feature_table.shape[2]
    C = feature_table.shape[-1]
    M, N = B * P, B * P * L

    # Gathers + layout prep stay in XLA (fuse with the gathers; the kernel sees
    # flat 2-D, lane-friendlier operands and a single stacked pos/neg operand).
    user_emb = user_table[user_ids]                                      # [B, D]
    profile_m = item_table[profile_ids].reshape(M, D)                    # [M, D]
    feat2d = feature_table[profile_ids].reshape(N, C)                    # [N, C]
    mask_m = (profile_ids != 0).astype(jnp.float32).reshape(M, 1)        # [M, 1]
    posneg = jnp.stack([item_table[pos], item_table[neg]], axis=1)       # [B, 2, D]

    vmem = lambda: pl.BlockSpec(memory_space=pltpu.MemorySpace.VMEM)
    out = pl.pallas_call(
        acf_kernel,
        out_shape=jax.ShapeDtypeStruct((B, D + 2), jnp.float32),
        in_specs=[vmem() for _ in range(7)],
        out_specs=vmem(),
    )(feat2d, user_emb, profile_m, mask_m, posneg, wmat, wvec)
    # TODO(synk): for large batches switch to a grid over B*P with BlockSpec
    # index_maps, dimension_semantics=("parallel",) and (on v6e/v7x) bf16
    # matmul operands; at the toy shape a single whole-array invocation is best.
    return out[:, :D], out[:, D], out[:, D + 1]


def acf_reference(user_ids, profile_ids, pos, neg, user_table, item_table,
                  feature_table, p):
    """Pure-JAX reference mirroring the PyTorch forward semantics (unfused)."""
    B, P = profile_ids.shape
    D = item_table.shape[-1]
    C = feature_table.shape[-1]
    L = feature_table.shape[1] * feature_table.shape[2]
    user_emb = user_table[user_ids]
    profile = item_table[profile_ids]
    feat = feature_table[profile_ids].reshape(B, P, L, C)
    mask_f = (profile_ids != 0).astype(jnp.float32)
    pos_emb, neg_emb = item_table[pos], item_table[neg]

    x = feat.reshape(B * P * L, C) @ p["Wr"] + p["br"]
    x_tilde = x @ p["Wxf"] + p["bxf"]
    u_f = user_emb @ p["Wuf"] + p["buf"]
    h = jnp.maximum(x_tilde.reshape(B, P, L, -1) + u_f[:, None, None, :], 0.0)
    beta = (h.reshape(B * P * L, -1) @ p["Wwf"] + p["bwf"]).reshape(B, P, L)
    beta = jax.nn.softmax(beta, axis=-1)
    pooled = jnp.sum(beta[..., None] * x.reshape(B, P, L, -1), axis=2)
    pooled = pooled * mask_f[:, :, None]

    u = user_emb @ p["Wu"] + p["bu"]
    pq = (profile.reshape(B * P, D) @ p["Wp"] + p["bp"]).reshape(B, P, D)
    cm = (pooled.reshape(B * P, D) @ p["Wx"] + p["bx"]).reshape(B, P, D)
    a = jnp.maximum(u[:, None, :] + pq + cm, 0.0)
    logits = (a.reshape(B * P, D) @ p["Ww"] + p["bw"]).reshape(B, P)
    valid = mask_f > 0.0
    mlog = jnp.where(valid, logits, -1e30)
    m = jnp.max(mlog, axis=-1, keepdims=True)
    e2 = jnp.where(valid, jnp.exp(mlog - m), 0.0)
    denom = jnp.sum(e2, axis=-1, keepdims=True)
    alpha = jnp.where(denom > 0.0, e2 / denom, 0.0)
    user_out = u + jnp.sum(alpha[..., None] * profile, axis=1)
    pos_pred = jnp.sum(user_out * pos_emb, axis=-1) / D
    neg_pred = jnp.sum(user_out * neg_emb, axis=-1) / D
    return user_out, pos_pred, neg_pred


def init_params(key, D, C):
    ks = jax.random.split(key, 8)

    def kaiming(k, fan_in, shape):
        return jax.random.normal(k, shape, jnp.float32) * jnp.sqrt(2.0 / fan_in)

    zeros = lambda shape: jnp.zeros(shape, jnp.float32)
    return {
        # ACFFeatureNet: dim_reductor, w_x, w_u, w
        "Wr": kaiming(ks[0], C, (C, D)), "br": zeros((1, D)),
        "Wxf": kaiming(ks[1], D, (D, D)), "bxf": zeros((1, D)),
        "Wuf": kaiming(ks[2], D, (D, D)), "buf": zeros((1, D)),
        "Wwf": kaiming(ks[3], D, (D, 1)), "bwf": zeros((1, 1)),
        # ACFUserNet: w_u, w_p, w_x, w   (w_v exists in __init__ but is unused)
        "Wu": kaiming(ks[4], D, (D, D)), "bu": zeros((1, D)),
        "Wp": kaiming(ks[5], D, (D, D)), "bp": zeros((1, D)),
        "Wx": kaiming(ks[6], D, (D, D)), "bx": zeros((1, D)),
        "Ww": kaiming(ks[7], D, (D, 1)), "bw": zeros((1, 1)),
    }


if __name__ == "__main__":
    B = 2           # batch of users
    P = 4           # profile length (items per user)
    D = 32          # model_dim / emb_dim
    Hs = Ws = 4     # spatial dims of the item feature maps
    L = Hs * Ws     # flattened spatial locations
    C = 8           # input_feature_dim (channels of feature maps)
    num_items = 10  # item ids 1..num_items, 0 = pad
    num_users = 6

    key = jax.random.PRNGKey(0)
    k_par, k_item, k_user, k_feat, k_ids = jax.random.split(key, 5)
    params = init_params(k_par, D, C)
    wmat, wvec = pack_params(params, C, D)

    # Embedding tables (synthetic, deterministic). padding_idx=0 -> zero row.
    item_table = jax.random.normal(k_item, (num_items + 1, D), jnp.float32)
    item_table = item_table.at[0].set(0.0)
    user_table = jax.random.normal(k_user, (num_users, D), jnp.float32)
    # TODO(synk): original module loads feature maps from a .npy file; synthesized here.
    feature_table = jax.random.normal(k_feat, (num_items + 1, Hs, Ws, C), jnp.float32)
    feature_table = feature_table.at[0].set(0.0)

    k1, k2, k3, k4 = jax.random.split(k_ids, 4)
    user_ids = jax.random.randint(k1, (B,), 0, num_users)
    profile_ids = jax.random.randint(k2, (B, P), 1, num_items + 1)
    profile_ids = profile_ids.at[0, P - 1].set(0)  # include a padded slot
    pos = jax.random.randint(k3, (B,), 1, num_items + 1)
    neg = jax.random.randint(k4, (B,), 1, num_items + 1)

    user_out, pos_pred, neg_pred = acf_forward(
        user_ids, profile_ids, pos, neg, user_table, item_table, feature_table,
        wmat, wvec)
    jax.block_until_ready((user_out, pos_pred, neg_pred))

    ref_user, ref_pos, ref_neg = acf_reference(
        user_ids, profile_ids, pos, neg, user_table, item_table, feature_table,
        params)

    # Only source of difference vs the reference is f32 reassociation from the
    # wrapper-side weight folding / matmul fusions.
    assert jnp.allclose(user_out, ref_user, atol=1e-3, rtol=1e-3)
    assert jnp.allclose(pos_pred, ref_pos, atol=1e-3, rtol=1e-3)
    assert jnp.allclose(neg_pred, ref_neg, atol=1e-3, rtol=1e-3)

    print("KERNEL_OK")
</pallas_src>

<mosaic_0001>
module attributes {stable_mosaic.version = 11 : i64} {
  func.func @acf_kernel(%arg0: memref<128x8xf32, #tpu.memory_space<vmem>>, %arg1: memref<2x32xf32, #tpu.memory_space<vmem>>, %arg2: memref<8x32xf32, #tpu.memory_space<vmem>>, %arg3: memref<8x1xf32, #tpu.memory_space<vmem>>, %arg4: memref<2x2x32xf32, #tpu.memory_space<vmem>>, %arg5: memref<104x64xf32, #tpu.memory_space<vmem>>, %arg6: memref<8x64xf32, #tpu.memory_space<vmem>>, %arg7: memref<2x34xf32, #tpu.memory_space<vmem>>) attributes {dimension_semantics = [], scalar_prefetch = 0 : i64, scratch_operands = 0 : i64, tpu.core_type = #tpu.core_type<tc>} {
    %c0 = arith.constant 0 : index
    %c0_0 = arith.constant 0 : index
    %0 = vector.load %arg5[%c0, %c0_0] : memref<104x64xf32, #tpu.memory_space<vmem>>, vector<8x64xf32>
    %c8 = arith.constant 8 : index
    %c0_1 = arith.constant 0 : index
    %1 = vector.load %arg5[%c8, %c0_1] : memref<104x64xf32, #tpu.memory_space<vmem>>, vector<32x64xf32>
    %c40 = arith.constant 40 : index
    %c0_2 = arith.constant 0 : index
    %2 = vector.load %arg5[%c40, %c0_2] : memref<104x64xf32, #tpu.memory_space<vmem>>, vector<64x32xf32>
    %c0_3 = arith.constant 0 : index
    %c0_4 = arith.constant 0 : index
    %3 = vector.load %arg6[%c0_3, %c0_4] : memref<8x64xf32, #tpu.memory_space<vmem>>, vector<1x64xf32>
    %c1 = arith.constant 1 : index
    %c0_5 = arith.constant 0 : index
    %4 = vector.load %arg6[%c1, %c0_5] : memref<8x64xf32, #tpu.memory_space<vmem>>, vector<1x64xf32>
    %c2 = arith.constant 2 : index
    %c0_6 = arith.constant 0 : index
    %5 = vector.load %arg6[%c2, %c0_6] : memref<8x64xf32, #tpu.memory_space<vmem>>, vector<1x32xf32>
    %c2_7 = arith.constant 2 : index
    %c32 = arith.constant 32 : index
    %6 = vector.load %arg6[%c2_7, %c32] : memref<8x64xf32, #tpu.memory_space<vmem>>, vector<1x32xf32>
    %c3 = arith.constant 3 : index
    %c0_8 = arith.constant 0 : index
    %7 = vector.load %arg6[%c3, %c0_8] : memref<8x64xf32, #tpu.memory_space<vmem>>, vector<1x32xf32>
    %c0_9 = arith.constant 0 : index
    %c0_10 = arith.constant 0 : index
    %8 = vector.load %arg0[%c0_9, %c0_10] : memref<128x8xf32, #tpu.memory_space<vmem>>, vector<128x8xf32>
    %cst = arith.constant dense<0.000000e+00> : vector<128x64xf32>
    %9 = tpu.matmul %8, %0, %cst {dimension_numbers = #tpu.dot_dimension_numbers<[1], [0], [0], [1], [0, 0, 1, 1], [], []>} : vector<128x8xf32>, vector<8x64xf32>, vector<128x64xf32> -> vector<128x64xf32>
    %10 = vector.broadcast %3 : vector<1x64xf32> to vector<128x64xf32>
    %11 = arith.addf %9, %10 : vector<128x64xf32>
    %12 = vector.shape_cast %11 : vector<128x64xf32> to vector<8x16x64xf32>
    %13 = vector.extract_strided_slice %12 {offsets = [0, 0, 0], sizes = [8, 16, 32], strides = [1, 1, 1]} : vector<8x16x64xf32> to vector<8x16x32xf32>
    %14 = vector.extract_strided_slice %12 {offsets = [0, 0, 32], sizes = [8, 16, 32], strides = [1, 1, 1]} : vector<8x16x64xf32> to vector<8x16x32xf32>
    %c0_11 = arith.constant 0 : index
    %c0_12 = arith.constant 0 : index
    %15 = vector.load %arg1[%c0_11, %c0_12] : memref<2x32xf32, #tpu.memory_space<vmem>>, vector<2x32xf32>
    %cst_13 = arith.constant dense<0.000000e+00> : vector<2x64xf32>
    %16 = tpu.matmul %15, %1, %cst_13 {dimension_numbers = #tpu.dot_dimension_numbers<[1], [0], [0], [1], [0, 0, 1, 1], [], []>} : vector<2x32xf32>, vector<32x64xf32>, vector<2x64xf32> -> vector<2x64xf32>
    %17 = vector.broadcast %4 : vector<1x64xf32> to vector<2x64xf32>
    %18 = arith.addf %16, %17 : vector<2x64xf32>
    %19 = vector.shape_cast %18 : vector<2x64xf32> to vector<2x1x64xf32>
    %20 = vector.shape_cast %19 : vector<2x1x64xf32> to vector<2x1x64xf32>
    %21 = vector.broadcast %20 : vector<2x1x64xf32> to vector<2x4x64xf32>
    %22 = vector.shape_cast %21 : vector<2x4x64xf32> to vector<8x64xf32>
    %23 = vector.extract_strided_slice %22 {offsets = [0, 0], sizes = [8, 32], strides = [1, 1]} : vector<8x64xf32> to vector<8x32xf32>
    %24 = vector.shape_cast %23 : vector<8x32xf32> to vector<8x1x32xf32>
    %25 = vector.broadcast %24 : vector<8x1x32xf32> to vector<8x16x32xf32>
    %26 = arith.addf %14, %25 : vector<8x16x32xf32>
    %cst_14 = arith.constant 0.000000e+00 : f32
    %27 = vector.broadcast %cst_14 : f32 to vector<8x16x32xf32>
    %28 = arith.maximumf %26, %27 : vector<8x16x32xf32>
    %29 = vector.shape_cast %6 : vector<1x32xf32> to vector<1x1x32xf32>
    %30 = vector.broadcast %29 : vector<1x1x32xf32> to vector<8x16x32xf32>
    %31 = arith.mulf %28, %30 : vector<8x16x32xf32>
    %cst_15 = arith.constant dense<0.000000e+00> : vector<8x16xf32>
    %32 = vector.multi_reduction <add>, %31, %cst_15 [2] : vector<8x16x32xf32> to vector<8x16xf32>
    %33 = vector.shape_cast %32 : vector<8x16xf32> to vector<8x16x1xf32>
    %cst_16 = arith.constant dense<0xFF800000> : vector<8x1xf32>
    %34 = vector.multi_reduction <maximumf>, %33, %cst_16 [1] : vector<8x16x1xf32> to vector<8x1xf32>
    %35 = vector.shape_cast %34 : vector<8x1xf32> to vector<8x1x1xf32>
    %36 = vector.broadcast %35 : vector<8x1x1xf32> to vector<8x16x1xf32>
    %37 = arith.subf %33, %36 : vector<8x16x1xf32>
    %38 = math.exp %37 : vector<8x16x1xf32>
    %cst_17 = arith.constant dense<0.000000e+00> : vector<8x1xf32>
    %39 = vector.multi_reduction <add>, %38, %cst_17 [1] : vector<8x16x1xf32> to vector<8x1xf32>
    %40 = vector.shape_cast %39 : vector<8x1xf32> to vector<8x1x1xf32>
    %41 = tpu.reciprocal %40 : vector<8x1x1xf32> -> vector<8x1x1xf32>
    %42 = vector.broadcast %41 : vector<8x1x1xf32> to vector<8x16x1xf32>
    %43 = arith.mulf %38, %42 : vector<8x16x1xf32>
    %44 = vector.broadcast %43 : vector<8x16x1xf32> to vector<8x16x32xf32>
    %45 = arith.mulf %44, %13 : vector<8x16x32xf32>
    %cst_18 = arith.constant dense<0.000000e+00> : vector<8x32xf32>
    %46 = vector.multi_reduction <add>, %45, %cst_18 [1] : vector<8x16x32xf32> to vector<8x32xf32>
    %c0_19 = arith.constant 0 : index
    %c0_20 = arith.constant 0 : index
    %47 = vector.load %arg3[%c0_19, %c0_20] : memref<8x1xf32, #tpu.memory_space<vmem>>, vector<8x1xf32>
    %48 = vector.broadcast %47 : vector<8x1xf32> to vector<8x32xf32>
    %49 = arith.mulf %46, %48 : vector<8x32xf32>
    %c0_21 = arith.constant 0 : index
    %c0_22 = arith.constant 0 : index
    %50 = vector.load %arg2[%c0_21, %c0_22] : memref<8x32xf32, #tpu.memory_space<vmem>>, vector<8x32xf32>
    %51 = tpu.concatenate %50, %49 in 1 : vector<8x32xf32>, vector<8x32xf32> -> vector<8x64xf32>
    %cst_23 = arith.constant dense<0.000000e+00> : vector<8x32xf32>
    %52 = tpu.matmul %51, %2, %cst_23 {dimension_numbers = #tpu.dot_dimension_numbers<[1], [0], [0], [1], [0, 0, 1, 1], [], []>} : vector<8x64xf32>, vector<64x32xf32>, vector<8x32xf32> -> vector<8x32xf32>
    %53 = vector.broadcast %5 : vector<1x32xf32> to vector<8x32xf32>
    %54 = arith.addf %52, %53 : vector<8x32xf32>
    %55 = vector.extract_strided_slice %22 {offsets = [0, 32], sizes = [8, 32], strides = [1, 1]} : vector<8x64xf32> to vector<8x32xf32>
    %56 = arith.addf %55, %54 : vector<8x32xf32>
    %cst_24 = arith.constant 0.000000e+00 : f32
    %57 = vector.broadcast %cst_24 : f32 to vector<8x32xf32>
    %58 = arith.maximumf %56, %57 : vector<8x32xf32>
    %59 = vector.broadcast %7 : vector<1x32xf32> to vector<8x32xf32>
    %60 = arith.mulf %58, %59 : vector<8x32xf32>
    %cst_25 = arith.constant dense<0.000000e+00> : vector<8xf32>
    %61 = vector.multi_reduction <add>, %60, %cst_25 [1] : vector<8x32xf32> to vector<8xf32>
    %62 = vector.shape_cast %61 : vector<8xf32> to vector<8x1xf32>
    %63 = vector.shape_cast %62 : vector<8x1xf32> to vector<2x4xf32>
    %c0_26 = arith.constant 0 : index
    %c0_27 = arith.constant 0 : index
    %64 = vector.load %arg3[%c0_26, %c0_27] : memref<8x1xf32, #tpu.memory_space<vmem>>, vector<8x1xf32>
    %65 = vector.shape_cast %64 : vector<8x1xf32> to vector<2x4xf32>
    %cst_28 = arith.constant 0.000000e+00 : f32
    %66 = vector.broadcast %cst_28 : f32 to vector<2x4xf32>
    %67 = arith.cmpf ogt, %65, %66 : vector<2x4xf32>
    %cst_29 = arith.constant -1.000000e+30 : f32
    %68 = vector.broadcast %cst_29 : f32 to vector<2x4xf32>
    %69 = arith.select %67, %63, %68 : vector<2x4xi1>, vector<2x4xf32>
    %cst_30 = arith.constant dense<0xFF800000> : vector<2xf32>
    %70 = vector.multi_reduction <maximumf>, %69, %cst_30 [1] : vector<2x4xf32> to vector<2xf32>
    %71 = vector.shape_cast %70 : vector<2xf32> to vector<2x1xf32>
    %72 = vector.broadcast %71 : vector<2x1xf32> to vector<2x4xf32>
    %73 = arith.subf %69, %72 : vector<2x4xf32>
    %74 = math.exp %73 : vector<2x4xf32>
    %cst_31 = arith.constant 0.000000e+00 : f32
    %75 = vector.broadcast %cst_31 : f32 to vector<2x4xf32>
    %76 = arith.select %67, %74, %75 : vector<2x4xi1>, vector<2x4xf32>
    %cst_32 = arith.constant dense<0.000000e+00> : vector<2xf32>
    %77 = vector.multi_reduction <add>, %76, %cst_32 [1] : vector<2x4xf32> to vector<2xf32>
    %78 = vector.shape_cast %77 : vector<2xf32> to vector<2x1xf32>
    %cst_33 = arith.constant 0.000000e+00 : f32
    %79 = vector.broadcast %cst_33 : f32 to vector<2x1xf32>
    %80 = arith.cmpf ogt, %78, %79 : vector<2x1xf32>
    %cst_34 = arith.constant 1.000000e+00 : f32
    %81 = vector.broadcast %cst_34 : f32 to vector<2x1xf32>
    %82 = arith.select %80, %78, %81 : vector<2x1xi1>, vector<2x1xf32>
    %83 = tpu.reciprocal %82 : vector<2x1xf32> -> vector<2x1xf32>
    %84 = vector.broadcast %83 : vector<2x1xf32> to vector<2x4xf32>
    %85 = arith.mulf %76, %84 : vector<2x4xf32>
    %86 = vector.shape_cast %85 : vector<2x4xf32> to vector<8x1xf32>
    %c0_35 = arith.constant 0 : index
    %c0_36 = arith.constant 0 : index
    %87 = vector.load %arg2[%c0_35, %c0_36] : memref<8x32xf32, #tpu.memory_space<vmem>>, vector<8x32xf32>
    %88 = vector.broadcast %86 : vector<8x1xf32> to vector<8x32xf32>
    %89 = arith.mulf %88, %87 : vector<8x32xf32>
    %90 = vector.shape_cast %89 : vector<8x32xf32> to vector<2x4x32xf32>
    %cst_37 = arith.constant dense<0.000000e+00> : vector<2x32xf32>
    %91 = vector.multi_reduction <add>, %90, %cst_37 [1] : vector<2x4x32xf32> to vector<2x32xf32>
    %92 = vector.extract_strided_slice %18 {offsets = [0, 32], sizes = [2, 32], strides = [1, 1]} : vector<2x64xf32> to vector<2x32xf32>
    %93 = arith.addf %92, %91 : vector<2x32xf32>
    %94 = vector.shape_cast %93 : vector<2x32xf32> to vector<2x1x32xf32>
    %c0_38 = arith.constant 0 : index
    %c0_39 = arith.constant 0 : index
    %c0_40 = arith.constant 0 : index
    %95 = vector.load %arg4[%c0_38, %c0_39, %c0_40] : memref<2x2x32xf32, #tpu.memory_space<vmem>>, vector<2x2x32xf32>
    %96 = vector.broadcast %94 : vector<2x1x32xf32> to vector<2x2x32xf32>
    %97 = arith.mulf %96, %95 : vector<2x2x32xf32>
    %cst_41 = arith.constant dense<0.000000e+00> : vector<2x2xf32>
    %98 = vector.multi_reduction <add>, %97, %cst_41 [2] : vector<2x2x32xf32> to vector<2x2xf32>
    %cst_42 = arith.constant 3.125000e-02 : f32
    %99 = vector.broadcast %cst_42 : f32 to vector<2x2xf32>
    %100 = arith.mulf %98, %99 : vector<2x2xf32>
    %101 = tpu.concatenate %93, %100 in 1 : vector<2x32xf32>, vector<2x2xf32> -> vector<2x34xf32>
    %c0_43 = arith.constant 0 : index
    %c0_44 = arith.constant 0 : index
    %102 = vector.load %arg7[%c0_43, %c0_44] : memref<2x34xf32, #tpu.memory_space<vmem>>, vector<2x34xf32>
    tpu.vector_store %arg7[%c0_43, %c0_44], %101 {strides = array<i32>} : memref<2x34xf32, #tpu.memory_space<vmem>>, vector<2x34xf32>,
    return
  }
}

</mosaic_0001>

<bundles_post_ra>
// kernel: acf_forward.1
= control target key start
LH: loop header
LB: loop body
LE: loop exit
PB: predicated region body
PF: predicated region fallthrough
CT: control target
= control target key end

     0   :  { %v1521_v0 = vmov 0.0   ;;  %vm1522_vm0 = vmmov 0   ;;  %vm63_vm1 = vcmask 64512   ;;  %vm262_vm2 = vcmask 261120   ;;  %s1525_s26 = smov 96   ;;  %s2090_s5 = inlined_call_operand.vmem [shape: f32[104,64], index: 5, kind: input, shape index: {}]   ;;  %s2091_s0 = inlined_call_operand.vmem [shape: f32[128,8], index: 0, kind: input, shape index: {}]   ;;  %s2092_s1 = inlined_call_operand.vmem [shape: f32[2,32], index: 1, kind: input, shape index: {}]   ;;  %s2093_s6 = inlined_call_operand.vmem [shape: f32[8,64], index: 6, kind: input, shape index: {}]   ;;  %s2094_s3 = inlined_call_operand.vmem [shape: f32[8,1], index: 3, kind: input, shape index: {}]   ;;  %s2095_s2 = inlined_call_operand.vmem [shape: f32[8,32], index: 2, kind: input, shape index: {}]   ;;  %s2096_s4 = inlined_call_operand.vmem [shape: f32[2,2,32], index: 4, kind: input, shape index: {}]   ;;  %s2097_s7 = inlined_call_operand.vmem [shape: f32[2,34], index: 7, kind: output, shape index: {}]  }
   0x1   :  { %1424 = vmatprep.subr.mxu1 %v1521_v0  ;;  %v30_v1 = vld [vmem:[%s2090_s5 + $0x20] sm:$0xff]  ;;  %v29_v2 = vld [vmem:[%s2090_s5 + $0x18] sm:$0xff]  ;;  %1432 = vmatprep.mubr.msk.f32.mxu1 %vm1522_vm0, %v1521_v0  ;;  %v28_v4 = vld [vmem:[%s2090_s5 + $0x10] sm:$0xff]  ;;  %v1523_v23 = vmov 1966171168   ;;  %v340_v25 = vlaneseq  ;;  %vm947_vm3 = vcmask 1041409  }
   0x2   :  { %1425 = vmatpush3.msra.mxu1 %v30_v1  ;;  %v26_v3 = vld [vmem:[%s2090_s5] sm:$0xff]  ;;  %v44_v6 = vld [vmem:[%s2091_s0 + $0x8] sm:$0xff]  ;;  %v45_v7 = vld [vmem:[%s2091_s0 + $0x10] sm:$0xff]  ;;  %v338_v24 = vunpack.c.l.s4 %v1523_v23  ;;  %vm950_vm4 = vcmask 1042434   ;;  %vm953_vm5 = vcmask 1043459   ;;  %vm956_vm6 = vcmask 1044484  }
   0x3   :  { %1426 = vmatprep.subr.mxu1 %v1521_v0  ;;  %1398 = vmatprep.subr.mxu0 %v26_v3  ;;  %v43_v5 = vld [vmem:[%s2091_s0] sm:$0xff]  ;;  %v27_v8 = vld [vmem:[%s2090_s5 + $0x8] sm:$0xff]  ;;  %v46_v10 = vld [vmem:[%s2091_s0 + $0x18] sm:$0xff]  ;;  %v1662_v27 = vshrl.u32 %v340_v25, 7  ;;  %vm959_vm7 = vcmask 1045509   ;;  %vm962_vm8 = vcmask 1046534  }
   0x4   :  { %1427 = vmatpush3.msra.mxu1 %v29_v2  ;;  %1399 = vmatpush3.msra.mxu0 %v26_v3  ;;  %v257_v9 = vld [vmem:[%s2092_s1] sm:$0x3]  ;;  %v48_v12 = vld [vmem:[%s2091_s0 + $0x28] sm:$0xff]  ;;  %v49_v13 = vld [vmem:[%s2091_s0 + $0x30] sm:$0xff]  ;;  %v339_v26 = vunpack.c.0.s8 %v338_v24  ;;  %vm965_vm9 = vcmask 1047559   ;;  %vm971_vm10 = vcmask 523264  }
   0x5   :  { %1428 = vmatprep.subr.mxu1 %v1521_v0  ;;  %1400 = vmatprep.mubr.msk.f32.mxu0 %vm63_vm1, %v43_v5  ;;  %v47_v11 = vld [vmem:[%s2091_s0 + $0x20] sm:$0xff]  ;;  %v50_v14 = vld [vmem:[%s2091_s0 + $0x38] sm:$0xff]  ;;  %v52_v16 = vld [vmem:[%s2091_s0 + $0x48] sm:$0xff]  ;;  %v1675_v34 = vsub.s32 0, %v1662_v27  ;;  %vm1123_vm13 = vcmask 25600   ;;  %vm1238_vm15 = vcmask 257024  }
   0x6   :  { %1429 = vmatpush3.msra.mxu1 %v28_v4  ;;  %1401 = vmatmul.mubr.msk.f32.vlgmr.msra.gmra.mxu0 %vm63_vm1, %v44_v6  ;;  %v51_v15 = vld [vmem:[%s2091_s0 + $0x40] sm:$0xff]  ;;  %v53_v17 = vld [vmem:[%s2091_s0 + $0x50] sm:$0xff]  ;;  %v54_v18 = vld [vmem:[%s2091_s0 + $0x58] sm:$0xff]  ;;  %v1668_v29 = vsub.s32 %v339_v26, %v1662_v27 }
   0x7   :  { %1430 = vmatprep.subr.mxu1 %v1521_v0  ;;  %1403 = vmatprep.mubr.msk.f32.mxu0 %vm63_vm1, %v45_v7  ;;  %v55_v19 = vld [vmem:[%s2091_s0 + $0x60] sm:$0xff]  ;;  %v56_v20 = vld [vmem:[%s2091_s0 + $0x68] sm:$0xff]  ;;  %v57_v21 = vld [vmem:[%s2091_s0 + $0x70] sm:$0xff] }
   0x8   :  { %1431 = vmatpush3.msra.mxu1 %v27_v8  ;;  %v58_v22 = vld [vmem:[%s2091_s0 + $0x78] sm:$0xff]  ;;  %v1362_v28 = vld [vmem:[%s2093_s6 + $0x1] ss:$0 sm:$0xff]  ;;  %s1524_s0 = smov 32   ;;  %v1712_v7 = vld [vmem:[%s2093_s6] ss:$0 sm:$0xff] }
   0x9   :  { %1433 = vmatmul.mubr.msk.f32.vlgmr.msra.gmra.mxu1 %vm262_vm2, %v257_v9  ;;  %1435 = vmatprep.subr.mxu1 %v1521_v0 }
   0xa   :  { %1404 = vmatmul.mubr.msk.f32.gmra.mxu0 %vm63_vm1, %v46_v10  ;;  %1451 = vmatprep.mubr.msk.f32.mxu1 %vm1522_vm0, %v1521_v0  ;;  %vm1313_vm0 = vcmask 254976  }
   0xb   :  { %1406 = vmatprep.mubr.msk.f32.mxu0 %vm63_vm1, %v47_v11 }
   0xe   :  { %1407 = vmatmul.mubr.msk.f32.gmra.mxu0 %vm63_vm1, %v48_v12 }
   0xf   :  { %1409 = vmatprep.mubr.msk.f32.mxu0 %vm63_vm1, %v49_v13 }
  0x12   :  { %1410 = vmatmul.mubr.msk.f32.gmra.mxu0 %vm63_vm1, %v50_v14 }
  0x13   :  { %1412 = vmatprep.mubr.msk.f32.mxu0 %vm63_vm1, %v51_v15 }
  0x16   :  { %1413 = vmatmul.mubr.msk.f32.gmra.mxu0 %vm63_vm1, %v52_v16 }
  0x17   :  { %1415 = vmatprep.mubr.msk.f32.mxu0 %vm63_vm1, %v53_v17 }
  0x1a   :  { %1416 = vmatmul.mubr.msk.f32.gmra.mxu0 %vm63_vm1, %v54_v18 }
  0x1b   :  { %1418 = vmatprep.mubr.msk.f32.mxu0 %vm63_vm1, %v55_v19 }
  0x1e   :  { %1419 = vmatmul.mubr.msk.f32.gmra.mxu0 %vm63_vm1, %v56_v20  ;;  %v1737_v20 = vld [vmem:[%s2093_s6 + $0x2] ss:$0 sm:$0xff] }
  0x1f   :  { %1421 = vmatprep.mubr.msk.f32.mxu0 %vm63_vm1, %v57_v21 }
  0x22   :  { %1422 = vmatmul.mubr.msk.f32.gmra.mxu0 %vm63_vm1, %v58_v22  ;;  %vm1339_vm1 = vcmask 271360  }
  0xc6   :  { %v1402_v60 = vpop.f32.mrf.mxu0 }
  0xc7   :  { %v1715_v9 = vadd.f32 %v1402_v60, %v1712_v7 }
  0xc8   :  { %v178_v61 = vpop.f32.mrf.mxu0 }
  0xc9   :  { %v332_v30 = vpop.f32.mrf.mxu1  ;;  %v1718_v10 = vadd.f32 %v1712_v7, %v178_v61 }
  0xca   :  { %v1670_v31 = vadd.f32 %v1362_v28, %v332_v30  ;;  %v1405_v62 = vpop.f32.mrf.mxu0 }
  0xcb   :  { %v1434_v32 = vpop.f32.mrf.mxu1  ;;  %v1721_v11 = vadd.f32 %v1405_v62, %v1712_v7 }
  0xcc   :  { %v343_v33 = vrot.slane %v1670_v31, %v1668_v29  ;;  %v188_v63 = vpop.f32.mrf.mxu0 }
  0xcd   :  { %v1724_v12 = vadd.f32 %v1712_v7, %v188_v63 }
  0xce   :  { %v344_v35 = vcombine.high %v343_v33, %v343_v33  ;;  %v351_v36 = vrot.slane %v343_v33, %v1668_v29  ;;  %v1408_v1 = vpop.f32.mrf.mxu0 }
  0xcf   :  { %v1729_v16 = vadd.f32 %v1408_v1, %v1712_v7 }
  0xd0   :  { %v358_v37 = vrot.slane %v344_v35, %v1668_v29  ;;  %v1680_v38 = vrot.slane %v351_v36, %v1675_v34  ;;  %v198_v2 = vpop.f32.mrf.mxu0 }
  0xd1   :  { %v1732_v17 = vadd.f32 %v1712_v7, %v198_v2 }
  0xd2   :  { %v1683_v39 = vrot.slane %v358_v37, %v1675_v34  ;;  %v375_v40 = vrot.slane %v1680_v38, %v1668_v29  ;;  %v1411_v3 = vpop.f32.mrf.mxu0 }
  0xd4   :  { %v383_v41 = vrot.slane %v375_v40, %v1668_v29  ;;  %v376_v42 = vcombine.high %v375_v40, %v375_v40  ;;  %v399_v43 = vrot.slane %v1683_v39, %v1668_v29  ;;  %v208_v4 = vpop.f32.mrf.mxu0 }
  0xd6   :  { %v420_v44 = vrot.slane %v383_v41, %v1675_v34  ;;  %v390_v45 = vrot.slane %v376_v42, %v1668_v29  ;;  %v400_v46 = vcombine.high %v399_v43, %v399_v43  ;;  %v391_v47 = vcombine.high %v383_v41, %v383_v41  ;;  %v1414_v5 = vpop.f32.mrf.mxu0 }
  0xd7   :  { %v407_v53 = vrot.slane %v399_v43, %v1668_v29  ;;  %v1744_v36 = vadd.f32 %v1414_v5, %v1712_v7  ;;  %v1754_v42 = vadd.f32 %v1411_v3, %v1712_v7  ;;  %v1757_v43 = vadd.f32 %v1712_v7, %v208_v4 }
  0xd8   :  { %449 = vrot.lane.b32.xlu1 %v420_v44, %s1524_s0  ;;  %v424_v48 = vrot.slane %v390_v45, %v1675_v34  ;;  %v392_v49 = vcombine.high %v390_v45, %v390_v45  ;;  %v414_v51 = vrot.slane %v400_v46, %v1668_v29  ;;  %v428_v52 = vrot.slane %v391_v47, %v1675_v34  ;;  %v218_v6 = vpop.f32.mrf.mxu0 }
  0xd9   :  { %v436_v56 = vrot.slane %v407_v53, %v1675_v34  ;;  %v415_v57 = vcombine.high %v407_v53, %v407_v53  ;;  %v1747_v37 = vadd.f32 %v1712_v7, %v218_v6 }
  0xda   :  { %451 = vrot.lane.b32.xlu0 %v424_v48, %s1524_s0  ;;  %v432_v50 = vrot.slane %v392_v49, %v1675_v34  ;;  %v440_v54 = vrot.slane %v414_v51, %v1675_v34  ;;  %v416_v55 = vcombine.high %v414_v51, %v414_v51  ;;  %v1417_v8 = vpop.f32.mrf.mxu0 }
  0xdb   :  { %v444_v59 = vrot.slane %v415_v57, %v1675_v34  ;;  %v1766_v53 = vadd.f32 %v1417_v8, %v1712_v7 }
  0xdc   :  { %455 = vrot.lane.b32.xlu1 %v432_v50, %s1524_s0  ;;  %v448_v58 = vrot.slane %v416_v55, %v1675_v34  ;;  %v228_v19 = vpop.f32.mrf.mxu0 }
  0xde   :  { %453 = vrot.lane.b32.xlu0 %v428_v52, %s1524_s0  ;;  %v1420_v30 = vpop.f32.mrf.mxu0 }
  0xdf   :  { %v1778_v2 = vadd.f32 %v1420_v30, %v1712_v7 }
  0xe0   :  { %459 = vrot.lane.b32.xlu1 %v440_v54, %s1524_s0  ;;  %v238_v47 = vpop.f32.mrf.mxu0  ;;  %v1769_v54 = vadd.f32 %v1712_v7, %v228_v19 }
  0xe1   :  { %v1781_v3 = vadd.f32 %v1712_v7, %v238_v47 }
  0xe2   :  { %457 = vrot.lane.b32.xlu0 %v436_v56, %s1524_s0  ;;  %v1423_v57 = vpop.f32.mrf.mxu0 }
  0xe4   :  { %463 = vrot.lane.b32.xlu1 %v448_v58, %s1524_s0  ;;  %v248_v6 = vpop.f32.mrf.mxu0 }
  0xe6   :  { %461 = vrot.lane.b32.xlu0 %v444_v59, %s1524_s0 }
 0x14a   :  { %v450_v13 = vpop.permute.xlu1 %449 }
 0x14b   :  { %v473_v14 = vadd.f32 %v450_v13, %v1718_v10  ;;  %v474_v15 = vadd.f32 %v450_v13, %v1715_v9 }
 0x14c   :  { %v452_v18 = vpop.permute.xlu0 %451 }
 0x14d   :  { %v489_v21 = vmax.f32 %v473_v14, 0.0  ;;  %v490_v22 = vmax.f32 %v474_v15, 0.0  ;;  %v475_v23 = vadd.f32 %v452_v18, %v1724_v12  ;;  %v476_v24 = vadd.f32 %v452_v18, %v1721_v11 }
 0x14e   :  { %v456_v44 = vpop.permute.xlu1 %455  ;;  %v1790_v15 = vadd.f32 %v1423_v57, %v1712_v7  ;;  %v1793_v18 = vadd.f32 %v1712_v7, %v248_v6 }
 0x14f   :  { %v491_v26 = vmax.f32 %v475_v23, 0.0  ;;  %v492_v28 = vmax.f32 %v476_v24, 0.0  ;;  %v510_v33 = vmul.f32 %v1737_v20, %v490_v22  ;;  %v509_v35 = vmul.f32 %v1737_v20, %v489_v21 }
 0x150   :  { %v454_v32 = vpop.permute.xlu0 %453  ;;  %v479_v55 = vadd.f32 %v456_v44, %v1757_v43  ;;  %v480_v56 = vadd.f32 %v456_v44, %v1754_v42 }
 0x151   :  { %v477_v40 = vadd.f32 %v454_v32, %v1732_v17  ;;  %v478_v41 = vadd.f32 %v454_v32, %v1729_v16  ;;  %543 = vrot.lane.b32.xlu1 %v510_v33, %s1525_s26  ;;  %541 = vrot.lane.b32.xlu0 %v509_v35, %s1525_s26  ;;  %v512_v49 = vmul.f32 %v1737_v20, %v492_v28 }
 0x152   :  { %v511_v50 = vmul.f32 %v1737_v20, %v491_v26  ;;  %v460_v62 = vpop.permute.xlu1 %459  ;;  %v495_v63 = vmax.f32 %v479_v55, 0.0  ;;  %v496_v1 = vmax.f32 %v480_v56, 0.0 }
 0x153   :  { %v493_v45 = vmax.f32 %v477_v40, 0.0  ;;  %v494_v46 = vmax.f32 %v478_v41, 0.0  ;;  %v483_v4 = vadd.f32 %v460_v62, %v1769_v54  ;;  %v484_v5 = vadd.f32 %v460_v62, %v1766_v53 }
 0x154   :  { %v458_v48 = vpop.permute.xlu0 %457  ;;  %v516_v19 = vmul.f32 %v1737_v20, %v496_v1  ;;  %v515_v21 = vmul.f32 %v1737_v20, %v495_v63  ;;  %v1526_v41 = vmov 0  }
 0x155   :  { %v481_v51 = vadd.f32 %v458_v48, %v1747_v37  ;;  %v482_v52 = vadd.f32 %v458_v48, %v1744_v36  ;;  %547 = vrot.lane.b32.xlu1 %v512_v49, %s1525_s26  ;;  %545 = vrot.lane.b32.xlu0 %v511_v50, %s1525_s26  ;;  %v514_v60 = vmul.f32 %v1737_v20, %v494_v46  ;;  %v499_v22 = vmax.f32 %v483_v4, 0.0 }
 0x156   :  { %v513_v61 = vmul.f32 %v1737_v20, %v493_v45  ;;  %v500_v23 = vmax.f32 %v484_v5, 0.0  ;;  %v464_v24 = vpop.permute.xlu1 %463  ;;  %1462 = vset.pattern.permute.xlu1 %v1526_v41  ;;  %1463 = vset.pattern.permute.xlu0 %v1526_v41  ;;  %v38_v41 = vld [vmem:[%s2090_s5 + $0x60] sm:$0xff] }
 0x157   :  { %v497_v58 = vmax.f32 %v481_v51, 0.0  ;;  %v498_v59 = vmax.f32 %v482_v52, 0.0  ;;  %v487_v30 = vadd.f32 %v464_v24, %v1793_v18  ;;  %v488_v7 = vadd.f32 %v464_v24, %v1790_v15  ;;  %1436 = vmatpush3.msra.mxu1 %v38_v41 }
 0x158   :  { %v462_v14 = vpop.permute.xlu0 %461  ;;  %v520_v35 = vmul.f32 %v1737_v20, %v500_v23  ;;  %v519_v40 = vmul.f32 %v1737_v20, %v499_v22  ;;  %1437 = vmatprep.subr.mxu1 %v1521_v0 }
 0x159   :  { %551 = vrot.lane.b32.xlu1 %v514_v60, %s1525_s26  ;;  %549 = vrot.lane.b32.xlu0 %v513_v61, %s1525_s26  ;;  %v518_v8 = vmul.f32 %v1737_v20, %v498_v59  ;;  %v517_v13 = vmul.f32 %v1737_v20, %v497_v58  ;;  %v485_v26 = vadd.f32 %v462_v14, %v1781_v3  ;;  %v503_v44 = vmax.f32 %v487_v30, 0.0 }
 0x15a   :  { %v486_v28 = vadd.f32 %v462_v14, %v1778_v2  ;;  %v504_v45 = vmax.f32 %v488_v7, 0.0 }
 0x15b   :  { %v501_v32 = vmax.f32 %v485_v26, 0.0  ;;  %v523_v49 = vmul.f32 %v1737_v20, %v503_v44  ;;  %v37_v44 = vld [vmem:[%s2090_s5 + $0x58] sm:$0xff] }
 0x15c   :  { %v502_v33 = vmax.f32 %v486_v28, 0.0  ;;  %v524_v48 = vmul.f32 %v1737_v20, %v504_v45  ;;  %v36_v45 = vld [vmem:[%s2090_s5 + $0x50] sm:$0xff]  ;;  %1438 = vmatpush3.msra.mxu1 %v37_v44 }
 0x15d   :  { %559 = vrot.lane.b32.xlu1 %v518_v8, %s1525_s26  ;;  %557 = vrot.lane.b32.xlu0 %v517_v13, %s1525_s26  ;;  %v521_v47 = vmul.f32 %v1737_v20, %v501_v32 }
 0x15e   :  { %v522_v46 = vmul.f32 %v1737_v20, %v502_v33  ;;  %1439 = vmatprep.subr.mxu1 %v1521_v0 }
 0x15f   :  { %1440 = vmatpush3.msra.mxu1 %v36_v45 }
 0x160   :  { %1441 = vmatprep.subr.mxu1 %v1521_v0 }
 0x161   :  { %555 = vrot.lane.b32.xlu1 %v516_v19, %s1525_s26  ;;  %553 = vrot.lane.b32.xlu0 %v515_v21, %s1525_s26 }
 0x165   :  { %563 = vrot.lane.b32.xlu1 %v520_v35, %s1525_s26  ;;  %561 = vrot.lane.b32.xlu0 %v519_v40, %s1525_s26  ;;  %v1834_v40 = vld [vmem:[%s2094_s3] sm:$0xff] }
 0x166   :  { %vm1099_vm11 = vcmp.gt.f32.partialorder %v1834_v40, 0.0 }
 0x169   :  { %567 = vrot.lane.b32.xlu1 %v522_v46, %s1525_s26  ;;  %565 = vrot.lane.b32.xlu0 %v521_v47, %s1525_s26  ;;  %v35_v46 = vld [vmem:[%s2090_s5 + $0x48] sm:$0xff]  ;;  %v34_v47 = vld [vmem:[%s2090_s5 + $0x40] sm:$0xff] }
 0x16a   :  { %1442 = vmatpush3.msra.mxu1 %v35_v46 }
 0x16b   :  { %1443 = vmatprep.subr.mxu1 %v1521_v0 }
 0x16c   :  { %1444 = vmatpush3.msra.mxu1 %v34_v47 }
 0x16d   :  { %571 = vrot.lane.b32.xlu1 %v524_v48, %s1525_s26  ;;  %569 = vrot.lane.b32.xlu0 %v523_v49, %s1525_s26 }
 0x16e   :  { %1445 = vmatprep.subr.mxu1 %v1521_v0 }
 0x1c3   :  { %v544_v50 = vpop.permute.xlu1 %543  ;;  %v542_v51 = vpop.permute.xlu0 %541 }
 0x1c4   :  { %v592_v52 = vsel %vm262_vm2, %v544_v50, 0.0  ;;  %v589_v55 = vsel %vm262_vm2, %v542_v51, 0.0  ;;  %v33_v50 = vld [vmem:[%s2090_s5 + $0x38] sm:$0xff] }
 0x1c5   :  { %593 = vadd.xlane.f32.xlu0 %v592_v52  ;;  %590 = vadd.xlane.f32.xlu1 %v589_v55  ;;  %v32_v52 = vld [vmem:[%s2090_s5 + $0x30] sm:$0xff] }
 0x1c6   :  { %1446 = vmatpush3.msra.mxu1 %v33_v50 }
 0x1c7   :  { %v548_v56 = vpop.permute.xlu1 %547  ;;  %v546_v57 = vpop.permute.xlu0 %545  ;;  %1447 = vmatprep.subr.mxu1 %v1521_v0 }
 0x1c8   :  { %v598_v58 = vsel %vm262_vm2, %v548_v56, 0.0  ;;  %v595_v59 = vsel %vm262_vm2, %v546_v57, 0.0  ;;  %1448 = vmatpush3.msra.mxu1 %v32_v52 }
 0x1c9   :  { %599 = vadd.xlane.f32.xlu1 %v598_v58  ;;  %596 = vadd.xlane.f32.xlu0 %v595_v59 }
 0x1ca   :  { %1449 = vmatprep.subr.mxu1 %v1521_v0 }
 0x1cb   :  { %v552_v20 = vpop.permute.xlu1 %551  ;;  %v550_v60 = vpop.permute.xlu0 %549 }
 0x1cc   :  { %v601_v61 = vsel %vm262_vm2, %v550_v60, 0.0  ;;  %v604_v1 = vsel %vm262_vm2, %v552_v20, 0.0 }
 0x1cd   :  { %602 = vadd.xlane.f32.xlu0 %v601_v61 }
 0x1cf   :  { %v560_v62 = vpop.permute.xlu1 %559  ;;  %v558_v63 = vpop.permute.xlu0 %557 }
 0x1d0   :  { %v613_v4 = vsel %vm262_vm2, %v558_v63, 0.0  ;;  %v616_v8 = vsel %vm262_vm2, %v560_v62, 0.0 }
 0x1d1   :  { %605 = vadd.xlane.f32.xlu0 %v604_v1  ;;  %614 = vadd.xlane.f32.xlu1 %v613_v4 }
 0x1d3   :  { %v556_v5 = vpop.permute.xlu1 %555  ;;  %v554_v6 = vpop.permute.xlu0 %553 }
 0x1d4   :  { %v607_v13 = vsel %vm262_vm2, %v554_v6, 0.0  ;;  %v610_v21 = vsel %vm262_vm2, %v556_v5, 0.0 }
 0x1d5   :  { %617 = vadd.xlane.f32.xlu0 %v616_v8  ;;  %608 = vadd.xlane.f32.xlu1 %v607_v13 }
 0x1d7   :  { %v564_v14 = vpop.permute.xlu1 %563  ;;  %v562_v19 = vpop.permute.xlu0 %561 }
 0x1d8   :  { %v619_v22 = vsel %vm262_vm2, %v562_v19, 0.0  ;;  %v622_v26 = vsel %vm262_vm2, %v564_v14, 0.0 }
 0x1d9   :  { %611 = vadd.xlane.f32.xlu0 %v610_v21  ;;  %620 = vadd.xlane.f32.xlu1 %v619_v22 }
 0x1db   :  { %v568_v23 = vpop.permute.xlu1 %567  ;;  %v566_v24 = vpop.permute.xlu0 %565 }
 0x1dc   :  { %v625_v28 = vsel %vm262_vm2, %v566_v24, 0.0  ;;  %v628_v7 = vsel %vm262_vm2, %v568_v23, 0.0 }
 0x1dd   :  { %623 = vadd.xlane.f32.xlu0 %v622_v26  ;;  %626 = vadd.xlane.f32.xlu1 %v625_v28 }
 0x1df   :  { %v570_v30 = vpop.permute.xlu0 %569  ;;  %v572_v33 = vpop.permute.xlu1 %571 }
 0x1e0   :  { %v631_v32 = vsel %vm262_vm2, %v570_v30, 0.0  ;;  %v634_v35 = vsel %vm262_vm2, %v572_v33, 0.0 }
 0x1e1   :  { %629 = vadd.xlane.f32.xlu0 %v628_v7  ;;  %632 = vadd.xlane.f32.xlu1 %v631_v32 }
 0x1e5   :  { %635 = vadd.xlane.f32.xlu0 %v634_v35 }
 0x1f2   :  { %912 = vperm.xlu1 %1462, %v1834_v40  }
 0x24e   :  { %v591_v48 = vpop.xlane.xlu1 %590  ;;  %v594_v49 = vpop.xlane.xlu0 %593 }
 0x24f   :  { %v637_v51 = vmax.f32 %v591_v48, %v594_v49 }
 0x251   :  { %v638_v55 = vrot.slane %v637_v51, 4 }
 0x252   :  { %v600_v56 = vpop.xlane.xlu1 %599  ;;  %v597_v57 = vpop.xlane.xlu0 %596 }
 0x253   :  { %v639_v58 = vmax.f32 %v637_v51, %v638_v55  ;;  %v644_v59 = vmax.f32 %v597_v57, %v600_v56 }
 0x255   :  { %v640_v20 = vrot.slane %v639_v58, 2  ;;  %v645_v60 = vrot.slane %v644_v59, 4 }
 0x256   :  { %v603_v61 = vpop.xlane.xlu0 %602 }
 0x257   :  { %v641_v62 = vmax.f32 %v639_v58, %v640_v20  ;;  %v646_v63 = vmax.f32 %v644_v59, %v645_v60 }
 0x259   :  { %v642_v1 = vrot.slane %v641_v62, 1  ;;  %v647_v4 = vrot.slane %v646_v63, 2 }
 0x25a   :  { %v1865_v5 = vpop.xlane.xlu1 %614  ;;  %v606_v6 = vpop.xlane.xlu0 %605 }
 0x25b   :  { %v643_v8 = vmax.f32 %v641_v62, %v642_v1  ;;  %v648_v13 = vmax.f32 %v646_v63, %v647_v4  ;;  %v651_v14 = vmax.f32 %v603_v61, %v606_v6 }
 0x25d   :  { %v693_v19 = vsub.f32 %v591_v48, %v643_v8  ;;  %v694_v21 = vsub.f32 %v594_v49, %v643_v8  ;;  %v649_v22 = vrot.slane %v648_v13, 1  ;;  %v652_v23 = vrot.slane %v651_v14, 4 }
 0x25e   :  { %v1867_v24 = vpop.xlane.xlu1 %608  ;;  %v618_v0 = vpop.xlane.xlu0 %617 }
 0x25f   :  { %v709_v26 = vmul.f32 1.442695, %v693_v19  ;;  %v711_v28 = vmul.f32 1.442695, %v694_v21  ;;  %v650_v30 = vmax.f32 %v648_v13, %v649_v22  ;;  %v653_v7 = vmax.f32 %v651_v14, %v652_v23 }
 0x260   :  { %v665_v32 = vmax.f32 %v1865_v5, %v618_v0 }
 0x261   :  { %1466 = vpow2.f32 %v709_v26  ;;  %v695_v33 = vsub.f32 %v597_v57, %v650_v30  ;;  %v696_v35 = vsub.f32 %v600_v56, %v650_v30  ;;  %v654_v41 = vrot.slane %v653_v7, 2 }
 0x262   :  { %1468 = vpow2.f32 %v711_v28  ;;  %v666_v44 = vrot.slane %v665_v32, 4  ;;  %v1870_v45 = vpop.xlane.xlu1 %620  ;;  %v612_v46 = vpop.xlane.xlu0 %611 }
 0x263   :  { %v713_v47 = vmul.f32 1.442695, %v695_v33  ;;  %v715_v48 = vmul.f32 1.442695, %v696_v35  ;;  %v655_v49 = vmax.f32 %v653_v7, %v654_v41  ;;  %v658_v50 = vmax.f32 %v1867_v24, %v612_v46 }
 0x264   :  { %v667_v51 = vmax.f32 %v665_v32, %v666_v44 }
 0x265   :  { %1470 = vpow2.f32 %v713_v47  ;;  %v656_v52 = vrot.slane %v655_v49, 1  ;;  %v659_v55 = vrot.slane %v658_v50, 4 }
 0x266   :  { %1472 = vpow2.f32 %v715_v48  ;;  %v668_v58 = vrot.slane %v667_v51, 2  ;;  %v624_v59 = vpop.xlane.xlu0 %623  ;;  %v1874_v62 = vpop.xlane.xlu1 %626 }
 0x267   :  { %v657_v57 = vmax.f32 %v655_v49, %v656_v52  ;;  %v660_v56 = vmax.f32 %v658_v50, %v659_v55  ;;  %v672_v20 = vmax.f32 %v1870_v45, %v624_v59 }
 0x268   :  { %v669_v60 = vmax.f32 %v667_v51, %v668_v58 }
 0x269   :  { %v697_v63 = vsub.f32 %v603_v61, %v657_v57  ;;  %v698_v1 = vsub.f32 %v606_v6, %v657_v57  ;;  %v661_v4 = vrot.slane %v660_v56, 2  ;;  %v673_v8 = vrot.slane %v672_v20, 4 }
 0x26a   :  { %v670_v13 = vrot.slane %v669_v60, 1  ;;  %v1876_v14 = vpop.xlane.xlu0 %629  ;;  %v1883_v33 = vpop.xlane.xlu1 %632 }
 0x26b   :  { %v717_v19 = vmul.f32 1.442695, %v697_v63  ;;  %v719_v21 = vmul.f32 1.442695, %v698_v1  ;;  %v662_v22 = vmax.f32 %v660_v56, %v661_v4  ;;  %v674_v23 = vmax.f32 %v672_v20, %v673_v8 }
 0x26c   :  { %v671_v26 = vmax.f32 %v669_v60, %v670_v13  ;;  %v679_v28 = vmax.f32 %v1874_v62, %v1876_v14 }
 0x26d   :  { %1474 = vpow2.f32 %v717_v19  ;;  %v663_v30 = vrot.slane %v662_v22, 1  ;;  %v675_v7 = vrot.slane %v674_v23, 2 }
 0x26e   :  { %v1880_v32 = vpop.eup %1466  ;;  %1476 = vpow2.f32 %v719_v21  ;;  %v701_v61 = vsub.f32 %v1865_v5, %v671_v26  ;;  %v702_v6 = vsub.f32 %v618_v0, %v671_v26  ;;  %v680_v35 = vrot.slane %v679_v28, 4  ;;  %v1885_v41 = vpop.xlane.xlu0 %635 }
 0x26f   :  { %v1887_v44 = vpop.eup %1468  ;;  %v664_v47 = vmax.f32 %v662_v22, %v663_v30  ;;  %v676_v48 = vmax.f32 %v674_v23, %v675_v7  ;;  %v686_v49 = vmax.f32 %v1883_v33, %v1885_v41 }
 0x270   :  { %v741_v50 = vadd.f32 %v1887_v44, %v1880_v32  ;;  %v725_v51 = vmul.f32 1.442695, %v701_v61  ;;  %v727_v52 = vmul.f32 1.442695, %v702_v6  ;;  %v681_v55 = vmax.f32 %v679_v28, %v680_v35 }
 0x271   :  { %v699_v5 = vsub.f32 %v1867_v24, %v664_v47  ;;  %v700_v0 = vsub.f32 %v612_v46, %v664_v47  ;;  %v677_v58 = vrot.slane %v676_v48, 1  ;;  %v687_v57 = vrot.slane %v686_v49, 4 }
 0x272   :  { %v1894_v56 = vpop.eup %1470  ;;  %v742_v20 = vrot.slane %v741_v50, 4  ;;  %1478 = vpow2.f32 %v725_v51  ;;  %v682_v60 = vrot.slane %v681_v55, 2 }
 0x273   :  { %v1896_v63 = vpop.eup %1472  ;;  %1480 = vpow2.f32 %v727_v52  ;;  %v721_v1 = vmul.f32 1.442695, %v699_v5  ;;  %v723_v4 = vmul.f32 1.442695, %v700_v0  ;;  %v678_v8 = vmax.f32 %v676_v48, %v677_v58 }
 0x274   :  { %v743_v13 = vadd.f32 %v742_v20, %v741_v50  ;;  %v748_v19 = vadd.f32 %v1896_v63, %v1894_v56  ;;  %v683_v21 = vmax.f32 %v681_v55, %v682_v60  ;;  %v688_v24 = vmax.f32 %v686_v49, %v687_v57 }
 0x275   :  { %1482 = vpow2.f32 %v721_v1  ;;  %v703_v46 = vsub.f32 %v1870_v45, %v678_v8  ;;  %v704_v22 = vsub.f32 %v624_v59, %v678_v8 }
 0x276   :  { %v744_v23 = vrot.slane %v743_v13, 2  ;;  %v749_v26 = vrot.slane %v748_v19, 4  ;;  %1484 = vpow2.f32 %v723_v4  ;;  %v684_v28 = vrot.slane %v683_v21, 1 }
 0x277   :  { %v729_v30 = vmul.f32 1.442695, %v703_v46  ;;  %v731_v7 = vmul.f32 1.442695, %v704_v22  ;;  %v689_v61 = vrot.slane %v688_v24, 2 }
 0x278   :  { %v745_v6 = vadd.f32 %v744_v23, %v743_v13  ;;  %v750_v35 = vadd.f32 %v749_v26, %v748_v19  ;;  %v685_v47 = vmax.f32 %v683_v21, %v684_v28 }
 0x279   :  { %1486 = vpow2.f32 %v729_v30  ;;  %v690_v48 = vmax.f32 %v688_v24, %v689_v61 }
 0x27a   :  { %v1901_v50 = vpop.eup %1474  ;;  %v746_v51 = vrot.slane %v745_v6, 1  ;;  %v751_v49 = vrot.slane %v750_v35, 2  ;;  %1488 = vpow2.f32 %v731_v7  ;;  %v705_v45 = vsub.f32 %v1874_v62, %v685_v47 }
 0x27b   :  { %v1904_v59 = vpop.eup %1476  ;;  %v706_v52 = vsub.f32 %v1876_v14, %v685_v47  ;;  %v691_v55 = vrot.slane %v690_v48, 1 }
 0x27c   :  { %v747_v5 = vadd.f32 %v746_v51, %v745_v6  ;;  %v752_v0 = vadd.f32 %v751_v49, %v750_v35  ;;  %v755_v58 = vadd.f32 %v1904_v59, %v1901_v50  ;;  %v733_v57 = vmul.f32 1.442695, %v705_v45 }
 0x27d   :  { %v735_v20 = vmul.f32 1.442695, %v706_v52  ;;  %v692_v60 = vmax.f32 %v690_v48, %v691_v55 }
 0x27e   :  { %1490 = vrcp.f32 %v747_v5  ;;  %v753_v1 = vrot.slane %v752_v0, 1  ;;  %v756_v4 = vrot.slane %v755_v58, 4 }
 0x27f   :  { %v1909_v8 = vpop.eup %1478  ;;  %1492 = vpow2.f32 %v733_v57  ;;  %v707_v62 = vsub.f32 %v1883_v33, %v692_v60  ;;  %v708_v13 = vsub.f32 %v1885_v41, %v692_v60 }
 0x280   :  { %v1913_v14 = vpop.eup %1480  ;;  %v754_v19 = vadd.f32 %v753_v1, %v752_v0  ;;  %v757_v21 = vadd.f32 %v756_v4, %v755_v58  ;;  %1494 = vpow2.f32 %v735_v20 }
 0x281   :  { %v769_v24 = vadd.f32 %v1913_v14, %v1909_v8  ;;  %v737_v46 = vmul.f32 1.442695, %v707_v62  ;;  %v739_v22 = vmul.f32 1.442695, %v708_v13 }
 0x282   :  { %v1917_v23 = vpop.eup %1482  ;;  %1496 = vrcp.f32 %v754_v19  ;;  %v758_v26 = vrot.slane %v757_v21, 2 }
 0x283   :  { %v1919_v28 = vpop.eup %1484  ;;  %v770_v30 = vrot.slane %v769_v24, 4  ;;  %1498 = vpow2.f32 %v737_v46 }
 0x284   :  { %v759_v33 = vadd.f32 %v758_v26, %v757_v21  ;;  %v762_v41 = vadd.f32 %v1919_v28, %v1917_v23  ;;  %1500 = vpow2.f32 %v739_v22 }
 0x285   :  { %v771_v7 = vadd.f32 %v770_v30, %v769_v24 }
 0x286   :  { %v1923_v61 = vpop.eup %1486  ;;  %v760_v6 = vrot.slane %v759_v33, 1  ;;  %v763_v35 = vrot.slane %v762_v41, 4 }
 0x287   :  { %v1925_v47 = vpop.eup %1488  ;;  %v772_v48 = vrot.slane %v771_v7, 2 }
 0x288   :  { %v761_v51 = vadd.f32 %v760_v6, %v759_v33  ;;  %v764_v49 = vadd.f32 %v763_v35, %v762_v41  ;;  %v776_v45 = vadd.f32 %v1925_v47, %v1923_v61 }
 0x289   :  { %v773_v52 = vadd.f32 %v772_v48, %v771_v7 }
 0x28a   :  { %1502 = vrcp.f32 %v761_v51  ;;  %v765_v55 = vrot.slane %v764_v49, 2  ;;  %v777_v5 = vrot.slane %v776_v45, 4 }
 0x28b   :  { %v1491_v0 = vpop.eup %1490  ;;  %v774_v58 = vrot.slane %v773_v52, 1 }
 0x28c   :  { %v1929_v57 = vpop.eup %1492  ;;  %v766_v20 = vadd.f32 %v765_v55, %v764_v49  ;;  %v778_v60 = vadd.f32 %v777_v5, %v776_v45  ;;  %v805_v62 = vmul.f32 %v1491_v0, %v1880_v32  ;;  %v806_v24 = vmul.f32 %v1491_v0, %v1887_v44 }
 0x28d   :  { %v1931_v1 = vpop.eup %1494  ;;  %v775_v4 = vadd.f32 %v774_v58, %v773_v52 }
 0x28e   :  { %v767_v13 = vrot.slane %v766_v20, 1  ;;  %v779_v19 = vrot.slane %v778_v60, 2  ;;  %v783_v46 = vadd.f32 %v1931_v1, %v1929_v57  ;;  %v821_v6 = vmul.f32 %v805_v62, %v1718_v10 }
 0x28f   :  { %v1497_v21 = vpop.eup %1496  ;;  %1504 = vrcp.f32 %v775_v4  ;;  %v822_v51 = vmul.f32 %v806_v24, %v1715_v9 }
 0x290   :  { %v1937_v22 = vpop.eup %1498  ;;  %v807_v26 = vmul.f32 %v1497_v21, %v1894_v56  ;;  %v808_v30 = vmul.f32 %v1497_v21, %v1896_v63  ;;  %v768_v41 = vadd.f32 %v767_v13, %v766_v20  ;;  %v780_v7 = vadd.f32 %v779_v19, %v778_v60 }
 0x291   :  { %v1941_v33 = vpop.eup %1500  ;;  %v784_v32 = vrot.slane %v783_v46, 4 }
 0x292   :  { %v823_v35 = vmul.f32 %v807_v26, %v1724_v12  ;;  %v824_v44 = vmul.f32 %v808_v30, %v1721_v11  ;;  %v790_v48 = vadd.f32 %v1941_v33, %v1937_v22  ;;  %1506 = vrcp.f32 %v768_v41 }
 0x293   :  { %v781_v56 = vrot.slane %v780_v7, 1  ;;  %v785_v49 = vadd.f32 %v784_v32, %v783_v46  ;;  %v837_v12 = vsel %vm262_vm2, %v821_v6, 0.0  ;;  %v838_v11 = vsel %vm262_vm2, %v822_v51, 0.0 }
 0x294   :  { %v791_v63 = vrot.slane %v790_v48, 4  ;;  %v846_v45 = vsel %vm262_vm2, %v823_v35, 0.0  ;;  %v847_v52 = vsel %vm262_vm2, %v824_v44, 0.0  ;;  %v839_v24 = vadd.f32 %v838_v11, %v837_v12 }
 0x295   :  { %v782_v55 = vadd.f32 %v781_v56, %v780_v7  ;;  %v786_v5 = vrot.slane %v785_v49, 2  ;;  %v848_v20 = vadd.f32 %v847_v52, %v846_v45 }
 0x296   :  { %v792_v10 = vadd.f32 %v791_v63, %v790_v48  ;;  %v840_v51 = vrot.slane %v839_v24, 4 }
 0x297   :  { %v1503_v0 = vpop.eup %1502  ;;  %1508 = vrcp.f32 %v782_v55  ;;  %v787_v58 = vadd.f32 %v786_v5, %v785_v49  ;;  %v849_v30 = vrot.slane %v848_v20, 4 }
 0x298   :  { %v809_v9 = vmul.f32 %v1503_v0, %v1901_v50  ;;  %v810_v60 = vmul.f32 %v1503_v0, %v1904_v59  ;;  %v793_v4 = vrot.slane %v792_v10, 2 }
 0x299   :  { %v788_v62 = vrot.slane %v787_v58, 1  ;;  %v850_v56 = vadd.f32 %v849_v30, %v848_v20  ;;  %v1979_v30 = vpop.permute.xlu1 %912 }
 0x29a   :  { %v825_v13 = vmul.f32 %v809_v9, %v1732_v17  ;;  %v826_v19 = vmul.f32 %v810_v60, %v1729_v16  ;;  %v794_v21 = vadd.f32 %v793_v4, %v792_v10 }
 0x29b   :  { %v789_v46 = vadd.f32 %v788_v62, %v787_v58  ;;  %v851_v10 = vrot.slane %v850_v56, 2 }
 0x29c   :  { %v1505_v26 = vpop.eup %1504  ;;  %v855_v41 = vsel %vm262_vm2, %v825_v13, 0.0  ;;  %v856_v7 = vsel %vm262_vm2, %v826_v19, 0.0  ;;  %v795_v32 = vrot.slane %v794_v21, 1 }
 0x29d   :  { %v857_v6 = vadd.f32 %v856_v7, %v855_v41  ;;  %v813_v50 = vmul.f32 %v1505_v26, %v1909_v8  ;;  %v814_v59 = vmul.f32 %v1505_v26, %v1913_v14  ;;  %1510 = vrcp.f32 %v789_v46 }
 0x29e   :  { %v796_v35 = vadd.f32 %v795_v32, %v794_v21  ;;  %v852_v62 = vadd.f32 %v851_v10, %v850_v56 }
 0x29f   :  { %v858_v17 = vrot.slane %v857_v6, 4  ;;  %v829_v16 = vmul.f32 %v813_v50, %v1747_v37  ;;  %v830_v44 = vmul.f32 %v814_v59, %v1744_v36  ;;  %v1507_v48 = vpop.eup %1506  ;;  %v841_v36 = vadd.f32 %v840_v51, %v839_v24 }
 0x2a0   :  { %1512 = vrcp.f32 %v796_v35  ;;  %v811_v63 = vmul.f32 %v1507_v48, %v1917_v23  ;;  %v812_v45 = vmul.f32 %v1507_v48, %v1919_v28  ;;  %v853_v35 = vrot.slane %v852_v62, 1 }
 0x2a1   :  { %v874_v49 = vsel %vm262_vm2, %v830_v44, 0.0  ;;  %v859_v8 = vadd.f32 %v858_v17, %v857_v6  ;;  %v873_v14 = vsel %vm262_vm2, %v829_v16, 0.0  ;;  %v842_v4 = vrot.slane %v841_v36, 2 }
 0x2a2   :  { %v827_v52 = vmul.f32 %v811_v63, %v1757_v43  ;;  %v828_v55 = vmul.f32 %v812_v45, %v1754_v42  ;;  %v875_v37 = vadd.f32 %v874_v49, %v873_v14  ;;  %v915_v44 = vrot.slane %v1979_v30, 2 }
 0x2a3   :  { %v860_v58 = vrot.slane %v859_v8, 2  ;;  %v843_v59 = vadd.f32 %v842_v4, %v841_v36  ;;  %v854_v45 = vadd.f32 %v853_v35, %v852_v62  ;;  %v917_v62 = vrot.slane %v1979_v30, 4 }
 0x2a4   :  { %v1509_v5 = vpop.eup %1508  ;;  %v864_v0 = vsel %vm262_vm2, %v827_v52, 0.0  ;;  %v865_v12 = vsel %vm262_vm2, %v828_v55, 0.0  ;;  %v876_v20 = vrot.slane %v875_v37, 4 }
 0x2a5   :  { %v815_v11 = vmul.f32 %v1509_v5, %v1923_v61  ;;  %v816_v23 = vmul.f32 %v1509_v5, %v1925_v47  ;;  %v866_v28 = vadd.f32 %v865_v12, %v864_v0  ;;  %v861_v24 = vadd.f32 %v860_v58, %v859_v8 }
 0x2a6   :  { %v877_v60 = vadd.f32 %v876_v20, %v875_v37  ;;  %v844_v14 = vrot.slane %v843_v59, 1  ;;  %v918_v58 = vrot.slane %v1979_v30, 5 }
 0x2a7   :  { %v832_v9 = vmul.f32 %v816_v23, %v1766_v53  ;;  %v831_v43 = vmul.f32 %v815_v11, %v1769_v54  ;;  %v867_v42 = vrot.slane %v866_v28, 4  ;;  %v914_v53 = vrot.slane %v1979_v30, 1 }
 0x2a8   :  { %v878_v41 = vrot.slane %v877_v60, 2  ;;  %v862_v16 = vrot.slane %v861_v24, 1 }
 0x2a9   :  { %v882_v13 = vsel %vm262_vm2, %v831_v43, 0.0  ;;  %v883_v19 = vsel %vm262_vm2, %v832_v9, 0.0  ;;  %v868_v61 = vadd.f32 %v867_v42, %v866_v28  ;;  %v930_v23 = vmul.f32 %v914_v53, %v854_v45 }
 0x2aa   :  { %v1511_v21 = vpop.eup %1510  ;;  %v884_v46 = vadd.f32 %v883_v19, %v882_v13  ;;  %v879_v63 = vadd.f32 %v878_v41, %v877_v60  ;;  %v863_v52 = vadd.f32 %v862_v16, %v861_v24  ;;  %v845_v28 = vadd.f32 %v844_v14, %v843_v59  ;;  %v31_v24 = vld [vmem:[%s2090_s5 + $0x28] sm:$0xff]  ;;  %v1520_v14 = vld [vmem:[%s2093_s6 + $0x2] ss:$0 sm:$0xff] }
 0x2ab   :  { %v817_v47 = vmul.f32 %v1511_v21, %v1929_v57  ;;  %v818_v26 = vmul.f32 %v1511_v21, %v1931_v1  ;;  %v869_v54 = vrot.slane %v868_v61, 2  ;;  %v946_v21 = vrot.slane %v930_v23, 7  ;;  %1450 = vmatpush3.msra.mxu1 %v31_v24 }
 0x2ac   :  { %v885_v7 = vrot.slane %v884_v46, 4  ;;  %v931_v20 = vmul.f32 %v915_v44, %v863_v52  ;;  %v920_v59 = vrot.slane %v1979_v30, 7  ;;  %v1097_v24 = vcombine.high %v1834_v40, %v1834_v40 }
 0x2ad   :  { %v1513_v32 = vpop.eup %1512  ;;  %v834_v6 = vmul.f32 %v818_v26, %v1778_v2  ;;  %v833_v50 = vmul.f32 %v817_v47, %v1781_v3  ;;  %v870_v1 = vadd.f32 %v869_v54, %v868_v61  ;;  %v929_v61 = vmul.f32 %v1979_v30, %v845_v28 }
 0x2ae   :  { %v820_v17 = vmul.f32 %v1513_v32, %v1941_v33  ;;  %v819_v57 = vmul.f32 %v1513_v32, %v1937_v22  ;;  %v886_v48 = vadd.f32 %v885_v7, %v884_v46  ;;  %v916_v22 = vrot.slane %v1979_v30, 3 }
 0x2af   :  { %v891_v51 = vsel %vm262_vm2, %v833_v50, 0.0  ;;  %v892_v56 = vsel %vm262_vm2, %v834_v6, 0.0  ;;  %v871_v3 = vrot.slane %v870_v1, 1  ;;  %v949_v46 = vrot.slane %v931_v20, 6 }
 0x2b0   :  { %v835_v49 = vmul.f32 %v819_v57, %v1793_v18  ;;  %v836_v2 = vmul.f32 %v820_v17, %v1790_v15  ;;  %v887_v8 = vrot.slane %v886_v48, 2  ;;  %v893_v33 = vadd.f32 %v892_v56, %v891_v51 }
 0x2b1   :  { %v872_v5 = vadd.f32 %v871_v3, %v870_v1  ;;  %v880_v18 = vrot.slane %v879_v63, 1  ;;  %v919_v6 = vrot.slane %v1979_v30, 6  ;;  %v948_v50 = vsel %vm947_vm3, %v946_v21, %v929_v61  ;;  %v2007_v30 = vld [vmem:[%s2095_s2] sm:$0xff] }
 0x2b2   :  { %v900_v55 = vsel %vm262_vm2, %v835_v49, 0.0  ;;  %v901_v37 = vsel %vm262_vm2, %v836_v2, 0.0  ;;  %v888_v36 = vadd.f32 %v887_v8, %v886_v48  ;;  %v894_v10 = vrot.slane %v893_v33, 4 }
 0x2b3   :  { %v902_v0 = vadd.f32 %v901_v37, %v900_v55  ;;  %v932_v60 = vmul.f32 %v916_v22, %v872_v5  ;;  %v881_v4 = vadd.f32 %v880_v18, %v879_v63  ;;  %v951_v35 = vsel %vm950_vm4, %v949_v46, %v948_v50 }
 0x2b4   :  { %v889_v12 = vrot.slane %v888_v36, 1  ;;  %v895_v15 = vadd.f32 %v894_v10, %v893_v33  ;;  %v1366_v33 = vld [vmem:[%s2093_s6 + $0x3] ss:$0 sm:$0xff]  ;;  %vm2035_vm12 = vcmp.gt.f32.partialorder %v1097_v24, 0.0 }
 0x2b5   :  { %v903_v11 = vrot.slane %v902_v0, 4  ;;  %v952_v54 = vrot.slane %v932_v60, 5  ;;  %v933_v41 = vmul.f32 %v917_v62, %v881_v4  ;;  %v1062_v5 = vcombine.high %v1366_v33, %v1366_v33 }
 0x2b6   :  { %v890_v9 = vadd.f32 %v889_v12, %v888_v36  ;;  %v896_v43 = vrot.slane %v895_v15, 2  ;;  %v1528_v4 = vmov 1985246804  }
 0x2b7   :  { %v904_v42 = vadd.f32 %v903_v11, %v902_v0  ;;  %v954_v16 = vsel %vm953_vm5, %v952_v54, %v951_v35  ;;  %v955_v44 = vrot.slane %v933_v41, 4  ;;  %v2042_v54 = vand.u32 127, %v340_v25 }
 0x2b8   :  { %v897_v13 = vadd.f32 %v896_v43, %v895_v15  ;;  %v934_v53 = vmul.f32 %v918_v58, %v890_v9 }
 0x2b9   :  { %v905_v19 = vrot.slane %v904_v42, 2  ;;  %v957_v56 = vsel %vm956_vm6, %v955_v44, %v954_v16 }
 0x2ba   :  { %v898_v47 = vrot.slane %v897_v13, 1  ;;  %v958_v1 = vrot.slane %v934_v53, 3 }
 0x2bb   :  { %v906_v26 = vadd.f32 %v905_v19, %v904_v42  ;;  %v1527_v42 = vmov 839922192  }
 0x2bc   :  { %v899_v7 = vadd.f32 %v898_v47, %v897_v13  ;;  %v960_v49 = vsel %vm959_vm7, %v958_v1, %v957_v56  ;;  %v1082_v60 = vunpack.c.l.s4 %v1527_v42 }
 0x2bd   :  { %v907_v32 = vrot.slane %v906_v26, 1 }
 0x2be   :  { %v935_v57 = vmul.f32 %v919_v6, %v899_v7  ;;  %v1083_v62 = vunpack.c.0.s8 %v1082_v60  ;;  %v1115_v7 = vsub.s32 %v2042_v54, %v1662_v27 }
 0x2bf   :  { %v908_v17 = vadd.f32 %v907_v32, %v906_v26 }
 0x2c0   :  { %v961_v51 = vrot.slane %v935_v57, 2 }
 0x2c1   :  { %v936_v48 = vmul.f32 %v920_v59, %v908_v17  ;;  %v1144_v17 = vsub.s32 1, %v1662_v27 }
 0x2c2   :  { %v963_v3 = vsel %vm962_vm8, %v961_v51, %v960_v49 }
 0x2c3   :  { %v964_v2 = vrot.slane %v936_v48, 1 }
 0x2c5   :  { %v966_v63 = vsel %vm965_vm9, %v964_v2, %v963_v3 }
 0x2c6   :  { %967 = vrot.lane.b32.xlu0 %v966_v63, %s1524_s0 }
 0x2ca   :  { %1063 = vrot.lane.b32.xlu0 %v1366_v33, %s1524_s0 }
 0x338   :  { %v968_v45 = vpop.permute.xlu0 %967 }
 0x339   :  { %v970_v8 = vsel %vm262_vm2, %v2007_v30, %v968_v45 }
 0x33a   :  { %1452 = vmatmul.mubr.msk.f32.vlgmr.msra.gmra.mxu1 %vm971_vm10, %v970_v8 }
 0x33c   :  { %v1064_v15 = vpop.permute.xlu0 %1063 }
 0x3fa   :  { %v1041_v22 = vpop.f32.mrf.mxu1 }
 0x3fb   :  { %v1042_v52 = vadd.f32 %v1520_v14, %v1041_v22 }
 0x3fc   :  { %v1453_v55 = vpop.f32.mrf.mxu1 }
 0x3fd   :  { %1047 = vrot.lane.b32.xlu1 %v1042_v52, %s1524_s0  ;;  %v1046_v37 = vcombine.high %v1042_v52, %v1042_v52 }
 0x401   :  { %1049 = vrot.lane.b32.xlu1 %v1046_v37, %s1524_s0 }
 0x405   :  { %1065 = vrot.lane.b32.xlu1 %v1062_v5, %s1524_s0 }
 0x46f   :  { %v1048_v36 = vpop.permute.xlu1 %1047 }
 0x470   :  { %v1053_v10 = vadd.f32 %v1048_v36, %v1680_v38  ;;  %v1089_v38 = vunpack.c.l.s4 %v1528_v4 }
 0x472   :  { %v1055_v18 = vmax.f32 %v1053_v10, 0.0  ;;  %v1090_v13 = vunpack.c.0.s8 %v1089_v38 }
 0x473   :  { %v1050_v0 = vpop.permute.xlu1 %1049 }
 0x474   :  { %v1054_v12 = vadd.f32 %v1050_v0, %v1683_v39  ;;  %v1069_v28 = vmul.f32 %v1064_v15, %v1055_v18  ;;  %v2026_v39 = vsub.s32 %v1083_v62, %v1662_v27  ;;  %v1093_v19 = vsub.s32 %v1090_v13, %v1662_v27 }
 0x476   :  { %v1056_v11 = vmax.f32 %v1054_v12, 0.0 }
 0x477   :  { %v1066_v23 = vpop.permute.xlu1 %1065 }
 0x478   :  { %v1070_v58 = vmul.f32 %v1066_v23, %v1056_v11 }
 0x47a   :  { %v1073_v20 = vcombine.low %v1069_v28, %v1070_v58 }
 0x47c   :  { %1074 = vrot.lane.b32.xlu0 %v1073_v20, %s1525_s26 }
 0x4ee   :  { %v1075_v9 = vpop.permute.xlu0 %1074 }
 0x4ef   :  { %v1077_v43 = vsel %vm262_vm2, %v1075_v9, 0.0  ;;  %v1234_v9 = vcombine.high %v2007_v30, %v2007_v30 }
 0x4f0   :  { %1078 = vadd.xlane.f32.xlu1 %v1077_v43 }
 0x579   :  { %v1079_v21 = vpop.xlane.xlu1 %1078 }
 0x57a   :  { %v1087_v61 = vrot.slane %v1079_v21, %v2026_v39  ;;  %v1094_v46 = vrot.slane %v1079_v21, %v1093_v19 }
 0x57c   :  { %v1101_v47 = vsel %vm1099_vm11, %v1087_v61, -1e+30  ;;  %v1102_v53 = vsel %vm2035_vm12, %v1094_v46, -1e+30 }
 0x57d   :  { %1106 = vperm.xlu0 %1463, %v1101_v47  }
 0x581   :  { %1109 = vperm.xlu0 %1463, %v1102_v53  }
 0x5f8   :  { %v1107_v41 = vpop.permute.xlu0 %1106 }
 0x5f9   :  { %v1116_v6 = vrot.slane %v1107_v41, %v1115_v7 }
 0x5fc   :  { %v1110_v32 = vpop.permute.xlu0 %1109 }
 0x5fd   :  { %v1120_v50 = vrot.slane %v1110_v32, %v1115_v7  ;;  %v1284_v32 = vld [vmem:[%s2096_s4 + $0x2] sm:$0x3] }
 0x5ff   :  { %v1121_v59 = vsel %vm947_vm3, %v1120_v50, %v1116_v6 }
 0x600   :  { %v1124_v35 = vsel %vm1123_vm13, %v1121_v59, -inf }
 0x601   :  { %1125 = vmax.xlane.f32.xlu0 %v1124_v35 }
 0x68a   :  { %v1126_v57 = vpop.xlane.xlu0 %1125 }
 0x68b   :  { %v1134_v16 = vrot.slane %v1126_v57, %v2026_v39 }
 0x68d   :  { %v1145_v25 = vrot.slane %v1134_v16, %v1144_v17  ;;  %v1138_v1 = vrot.slane %v1134_v16, %v1675_v34 }
 0x68f   :  { %1147 = vbcast.lane.b32.xlu0 %v1145_v25, 256  ;;  %1140 = vbcast.lane.b32.xlu1 %v1138_v1, 256 }
 0x701   :  { %v1148_v44 = vpop.permute.xlu0 %1147  ;;  %v1141_v48 = vpop.permute.xlu1 %1140 }
 0x702   :  { %v1152_v51 = vsub.f32 %v1102_v53, %v1148_v44  ;;  %v1151_v56 = vsub.f32 %v1101_v47, %v1141_v48 }
 0x704   :  { %v1153_v49 = vmul.f32 1.442695, %v1151_v56  ;;  %v1155_v2 = vmul.f32 1.442695, %v1152_v51 }
 0x706   :  { %1514 = vpow2.f32 %v1153_v49 }
 0x707   :  { %1516 = vpow2.f32 %v1155_v2 }
 0x713   :  { %v1515_v3 = vpop.eup %1514 }
 0x714   :  { %v1157_v63 = vsel %vm1099_vm11, %v1515_v3, 0.0  ;;  %v1517_v45 = vpop.eup %1516 }
 0x715   :  { %1162 = vperm.xlu1 %1462, %v1157_v63   ;;  %v1158_v8 = vsel %vm2035_vm12, %v1517_v45, 0.0 }
 0x719   :  { %1165 = vperm.xlu1 %1462, %v1158_v8  }
 0x790   :  { %v1163_v33 = vpop.permute.xlu1 %1162 }
 0x791   :  { %v1170_v14 = vrot.slane %v1163_v33, %v1115_v7 }
 0x794   :  { %v1166_v22 = vpop.permute.xlu1 %1165 }
 0x795   :  { %v1174_v52 = vrot.slane %v1166_v22, %v1115_v7 }
 0x797   :  { %v1175_v55 = vsel %vm947_vm3, %v1174_v52, %v1170_v14 }
 0x798   :  { %v1177_v37 = vsel %vm1123_vm13, %v1175_v55, 0.0 }
 0x799   :  { %1178 = vadd.xlane.f32.xlu1 %v1177_v37 }
 0x822   :  { %v1179_v5 = vpop.xlane.xlu1 %1178 }
 0x823   :  { %vm1180_vm14 = vcmp.gt.f32.partialorder %v1179_v5, 0.0 }
 0x824   :  { %v1181_v36 = vsel %vm1180_vm14, %v1179_v5, 1.0 }
 0x825   :  { %1518 = vrcp.f32 %v1181_v36 }
 0x832   :  { %v1519_v40 = vpop.eup %1518 }
 0x833   :  { %v1190_v10 = vrot.slane %v1519_v40, %v2026_v39 }
 0x835   :  { %v1194_v0 = vrot.slane %v1190_v10, %v1675_v34  ;;  %v1201_v18 = vrot.slane %v1190_v10, %v1144_v17 }
 0x837   :  { %1196 = vbcast.lane.b32.xlu0 %v1194_v0, 256 }
 0x83b   :  { %1203 = vbcast.lane.b32.xlu0 %v1201_v18, 256 }
 0x8a9   :  { %v1197_v12 = vpop.permute.xlu0 %1196 }
 0x8aa   :  { %v1207_v15 = vmul.f32 %v1197_v12, %v1157_v63 }
 0x8ac   :  { %1211 = vperm.xlu0 %1463, %v1207_v15  }
 0x8ad   :  { %v1204_v11 = vpop.permute.xlu0 %1203 }
 0x8ae   :  { %v1208_v23 = vmul.f32 %v1204_v11, %v1158_v8 }
 0x8b0   :  { %1223 = vperm.xlu0 %1463, %v1208_v23  }
 0x927   :  { %v1212_v28 = vpop.permute.xlu0 %1211 }
 0x928   :  { %v1220_v58 = vrot.slane %v1212_v28, %v2026_v39 }
 0x92a   :  { %v1236_v20 = vmul.f32 %v1220_v58, %v2007_v30 }
 0x92b   :  { %v1224_v43 = vpop.permute.xlu0 %1223 }
 0x92c   :  { %v1239_v42 = vsel %vm1238_vm15, %v1236_v20, 0.0  ;;  %v1232_v60 = vrot.slane %v1224_v43, %v2026_v39  ;;  %v1283_v39 = vld [vmem:[%s2096_s4] sm:$0x3] }
 0x92d   :  { %v1240_v4 = vrot.slane %v1239_v42, 4 }
 0x92e   :  { %v1237_v38 = vmul.f32 %v1234_v9, %v1232_v60 }
 0x92f   :  { %v1241_v62 = vadd.f32 %v1240_v4, %v1239_v42 }
 0x930   :  { %v1246_v13 = vsel %vm1238_vm15, %v1237_v38, 0.0 }
 0x931   :  { %v1242_v19 = vrot.slane %v1241_v62, 2  ;;  %v1247_v21 = vrot.slane %v1246_v13, 4 }
 0x933   :  { %v1243_v24 = vadd.f32 %v1242_v19, %v1241_v62  ;;  %v1248_v61 = vadd.f32 %v1247_v21, %v1246_v13 }
 0x935   :  { %v1249_v46 = vrot.slane %v1248_v61, 2  ;;  %v1244_v26 = vrot.slane %v1243_v24, 1 }
 0x937   :  { %v1250_v47 = vadd.f32 %v1249_v46, %v1248_v61  ;;  %v1245_v41 = vadd.f32 %v1244_v26, %v1243_v24 }
 0x939   :  { %v1251_v53 = vrot.slane %v1250_v47, 1 }
 0x93b   :  { %v1252_v7 = vadd.f32 %v1251_v53, %v1250_v47 }
 0x93d   :  { %v1255_v30 = vsel %vm947_vm3, %v1252_v7, %v1245_v41 }
 0x93e   :  { %1256 = vrot.lane.b32.xlu0 %v1255_v30, %s1524_s0 }
 0x942   :  { %1297 = vrot.lane.b32.xlu0 %v1283_v39, %s1524_s0 }
 0x946   :  { %1299 = vrot.lane.b32.xlu0 %v1284_v32, %s1524_s0 }
 0x9b0   :  { %v1257_v6 = vpop.permute.xlu0 %1256 }
 0x9b1   :  { %v1259_v50 = vadd.f32 %v1257_v6, %v1670_v31 }
 0x9b3   :  { %v1267_v59 = vrot.slane %v1259_v50, %v1668_v29 }
 0x9b4   :  { %v1298_v35 = vpop.permute.xlu0 %1297 }
 0x9b5   :  { %v1268_v17 = vcombine.high %v1267_v59, %v1267_v59  ;;  %v1275_v57 = vrot.slane %v1267_v59, %v1668_v29 }
 0x9b7   :  { %v1288_v16 = vrot.slane %v1275_v57, %v1675_v34  ;;  %v1282_v25 = vrot.slane %v1268_v17, %v1668_v29  ;;  %v1327_v29 = vadd.s32 4294967264, %v2042_v54 }
 0x9b8   :  { %v1300_v1 = vpop.permute.xlu0 %1299 }
 0x9b9   :  { %v1303_v44 = vmul.f32 %v1298_v35, %v1288_v16  ;;  %v1292_v48 = vrot.slane %v1282_v25, %v1675_v34  ;;  %v1330_v63 = vsub.s32 %v1327_v29, %v1662_v27 }
 0x9bb   :  { %v1304_v51 = vmul.f32 %v1300_v1, %v1292_v48  ;;  %1307 = vrot.lane.b32.xlu0 %v1303_v44, %s1525_s26 }
 0x9bd   :  { %1309 = vrot.lane.b32.xlu1 %v1304_v51, %s1525_s26 }
 0xa2d   :  { %v1308_v31 = vpop.permute.xlu0 %1307 }
 0xa2e   :  { %v1314_v56 = vsel %vm1313_vm0, %v1308_v31, 0.0 }
 0xa2f   :  { %v1310_v49 = vpop.permute.xlu1 %1309  ;;  %1315 = vadd.xlane.f32.xlu0 %v1314_v56 }
 0xa30   :  { %v1317_v2 = vsel %vm1313_vm0, %v1310_v49, 0.0 }
 0xa31   :  { %1318 = vadd.xlane.f32.xlu1 %v1317_v2 }
 0xa45   :  { %1322 = vrot.lane.b32.xlu0 %v1259_v50, %s1525_s26 }
 0xab8   :  { %v1316_v3 = vpop.xlane.xlu0 %1315 }
 0xab9   :  { %v1320_v34 = vmul.f32 0.03125, %v1316_v3 }
 0xaba   :  { %v1319_v45 = vpop.xlane.xlu1 %1318 }
 0xabb   :  { %v1321_v8 = vmul.f32 0.03125, %v1319_v45  ;;  %v1331_v33 = vrot.slane %v1320_v34, %v1330_v63 }
 0xabc   :  { %v1323_v52 = vpop.permute.xlu0 %1322 }
 0xabd   :  { %v1335_v22 = vrot.slane %v1321_v8, %v1330_v63 }
 0xabf   :  { %v1336_v14 = vsel %vm947_vm3, %v1335_v22, %v1331_v33 }
 0xac0   :  { %v1338_v55 = vsel %vm262_vm2, %v1323_v52, %v1336_v14 }
 0xac1   :  { %1340 = vst.msk [vmem:[%s2097_s7] sm:$0x3] %vm1339_vm1, %v1338_v55 }

</bundles_post_ra>
